<compile_context>
chip_gen: v5e
topology: v5e:2x2
jax: 0.10.0
libtpu: 0.0.40
codegen_flags: <defaults>
</compile_context>

<pallas_src>
import jax
import jax.numpy as jnp
import numpy as np
from jax import lax
from jax.experimental import pallas as pl
from jax.experimental.pallas import tpu as pltpu


_LANE = 128
# ~4 MiB per input block: sweet spot for v6e/v7x HBM streaming; v5e is covered by
# the explicit vmem_limit_bytes below (physical VMEM is 128 MiB there).
_TARGET_BLOCK_BYTES = 4 << 20


def _cdiv(a, b):
    return -(-a // b)


def _round_up(x, m):
    return (x + m - 1) // m * m


def _round_down(x, m):
    return x // m * m


def _make_sq_err_kernel(B, n_feat, TB, TF):
    """Kernel factory; B/n_feat/TB/TF are baked in as static Python ints."""
    mask_rows = (B % TB) != 0        # ragged batch tail in the last batch block
    mask_cols = (n_feat % TF) != 0   # ragged feature tail in the last feature block

    def kernel(pred_ref, tgt_ref, out_ref):
        # pred_ref / tgt_ref: VMEM [TB, TF] native-dtype tiles (lane-dense).
        # out_ref: VMEM f32 [1, 1, TB] -- per-sample (partial) sum of squared errors.
        d = pred_ref[...].astype(jnp.float32) - tgt_ref[...].astype(jnp.float32)
        sq = d * d                                              # VPU
        if mask_rows or mask_cols:
            # Boundary blocks read unspecified out-of-bounds data; zero it out
            # before the reduce (mandatory for the feature tail, cheap either way).
            mask = None
            if mask_rows:
                rows_left = B - pl.program_id(0) * TB
                row_ids = lax.broadcasted_iota(jnp.int32, (TB, TF), 0)
                mask = row_ids < rows_left
            if mask_cols:
                cols_left = n_feat - pl.program_id(1) * TF
                col_ids = lax.broadcasted_iota(jnp.int32, (TB, TF), 1)
                cmask = col_ids < cols_left
                mask = cmask if mask is None else (mask & cmask)
            sq = jnp.where(mask, sq, 0.0)
        out_ref[...] = jnp.sum(sq, axis=1)[None, None, :]       # (1, 1, TB)

    return kernel


def ddpm_loss(pred, target, timesteps, weight, scale=1.0):
    """DDPMLoss.forward equivalent:
       per-sample MSE -> timestep_weight_rescale -> 'mean' reduction.
    """
    B = pred.shape[0]
    n_feat = 1
    for s in pred.shape[1:]:
        n_feat *= int(s)

    itemsize = pred.dtype.itemsize
    sub = max(1, 32 // itemsize)          # sublane multiple: 8 f32, 16 bf16, 32 int8

    pred2 = pred.reshape(B, n_feat)       # no padding copies: lane dim is full extent
    tgt2 = target.reshape(B, n_feat)

    row_bytes = n_feat * itemsize

    if row_bytes * sub <= _TARGET_BLOCK_BYTES:
        # ---- common case: whole feature rows per block, tile only the batch ----
        TF, nf = n_feat, 1
        if B <= sub:
            TB = B                        # full-extent batch dim waives the sublane rule
        else:
            fit = _TARGET_BLOCK_BYTES // row_bytes
            TB = max(sub, _round_down(min(fit, B), sub))
            if B >= 2 * sub:
                # keep at least 2 grid blocks so both v7x TensorCores stream
                TB = min(TB, _round_up(_cdiv(B, 2), sub))
        nb = _cdiv(B, TB)
    else:
        # ---- huge samples: also tile the feature axis (guards v7x's 64 MiB VMEM) ----
        TB = B if B <= sub else sub
        tf_budget = _TARGET_BLOCK_BYTES // (TB * itemsize)
        if tf_budget >= n_feat:
            TF, nf = n_feat, 1
        else:
            TF = max(_LANE, _round_down(tf_budget, _LANE))
            nf = _cdiv(n_feat, TF)
        nb = _cdiv(B, TB)

    block_bytes = TB * TF * itemsize
    # 2 inputs x 2 pipeline buffers x block, plus headroom; never below ~16 MiB.
    vmem_limit = int(max(4 * block_bytes + (4 << 20), 16 << 20))

    cost = pl.CostEstimate(
        flops=3 * B * n_feat,                                  # sub, mul, add
        transcendentals=0,
        bytes_accessed=2 * B * n_feat * itemsize + nb * nf * TB * 4,
    )

    partial_sums = pl.pallas_call(
        _make_sq_err_kernel(B, n_feat, TB, TF),
        out_shape=jax.ShapeDtypeStruct((nb, nf, TB), jnp.float32),
        grid=(nb, nf),
        in_specs=[
            pl.BlockSpec((TB, TF), lambda i, j: (i, j)),
            pl.BlockSpec((TB, TF), lambda i, j: (i, j)),
        ],
        out_specs=pl.BlockSpec((1, 1, TB), lambda i, j: (i, j, 0)),
        compiler_params=pltpu.CompilerParams(
            # independent per-block outputs -> both TensorCores on v7x,
            # free on single-TC v5e/v6e.
            dimension_semantics=("parallel", "parallel"),
            vmem_limit_bytes=vmem_limit,
        ),
        cost_estimate=cost,
    )(pred2, tgt2)

    # ---- _forward_loss tail: fold feature-axis partials, per-sample MSE ----
    per_sample_sq = partial_sums.sum(axis=1).reshape(nb * TB)[:B]
    per_sample = per_sample_sq * (1.0 / float(n_feat))

    # ---- timestep_weight_rescale + 'mean' reduction (O(B) scalars, plain JAX) ----
    w = weight.astype(jnp.float32)[timesteps]
    loss = jnp.mean(per_sample * w * jnp.float32(scale))

    # TODO(synk): quartile_log_collect / dist.all_gather log collection is a
    # host/logging-only, no-grad side effect and is not reproduced here.
    return loss


if __name__ == "__main__":
    key = jax.random.PRNGKey(0)

    # --- primary example: small DDPM eps-prediction loss ---
    B, C, H, W = 2, 4, 16, 16
    T = 16
    SCALE = 1.0

    k_pred, k_tgt, k_ts, k_w = jax.random.split(key, 4)
    pred = jax.random.normal(k_pred, (B, C, H, W), dtype=jnp.float32)
    target = jax.random.normal(k_tgt, (B, C, H, W), dtype=jnp.float32)
    timesteps = jax.random.randint(k_ts, (B,), 0, T, dtype=jnp.int32)
    weight = 0.5 + jax.random.uniform(k_w, (T,), dtype=jnp.float32)  # positive weights

    loss = jax.block_until_ready(ddpm_loss(pred, target, timesteps, weight, SCALE))

    per_sample_ref = jnp.mean((pred - target) ** 2, axis=(1, 2, 3))
    ref = jnp.mean(per_sample_ref * weight[timesteps] * SCALE)
    np.testing.assert_allclose(np.asarray(loss), np.asarray(ref), rtol=1e-5, atol=1e-6)

    # --- secondary example: ragged batch / non-128 feature count (mask path) ---
    B2, C2, H2, W2 = 10, 3, 7, 5
    k_pred2, k_tgt2, k_ts2 = jax.random.split(jax.random.PRNGKey(1), 3)
    pred2 = jax.random.normal(k_pred2, (B2, C2, H2, W2), dtype=jnp.float32)
    target2 = jax.random.normal(k_tgt2, (B2, C2, H2, W2), dtype=jnp.float32)
    timesteps2 = jax.random.randint(k_ts2, (B2,), 0, T, dtype=jnp.int32)

    loss2 = jax.block_until_ready(ddpm_loss(pred2, target2, timesteps2, weight, SCALE))
    per_sample_ref2 = jnp.mean((pred2 - target2) ** 2, axis=(1, 2, 3))
    ref2 = jnp.mean(per_sample_ref2 * weight[timesteps2] * SCALE)
    np.testing.assert_allclose(np.asarray(loss2), np.asarray(ref2), rtol=1e-5, atol=1e-6)

    print("KERNEL_OK")
</pallas_src>

<mosaic_0001>
module attributes {stable_mosaic.version = 11 : i64} {
  func.func @kernel(%arg0: i32, %arg1: i32, %arg2: memref<2x1024xf32, #tpu.memory_space<vmem>>, %arg3: memref<2x1024xf32, #tpu.memory_space<vmem>>, %arg4: memref<1x1x2xf32, #tpu.memory_space<vmem>>) attributes {dimension_semantics = [#tpu.dimension_semantics<parallel>, #tpu.dimension_semantics<parallel>], iteration_bounds = array<i64: 1, 1>, scalar_prefetch = 0 : i64, scratch_operands = 0 : i64, tpu.core_type = #tpu.core_type<tc>, window_params = [{transform_indices = @transform_0, window_bounds = array<i64: 2, 1024>}, {transform_indices = @transform_1, window_bounds = array<i64: 2, 1024>}, {transform_indices = @transform_2, window_bounds = array<i64: 1, 1, 2>}]} {
    %c0 = arith.constant 0 : index
    %c0_0 = arith.constant 0 : index
    %0 = vector.load %arg2[%c0, %c0_0] : memref<2x1024xf32, #tpu.memory_space<vmem>>, vector<2x1024xf32>
    %c0_1 = arith.constant 0 : index
    %c0_2 = arith.constant 0 : index
    %1 = vector.load %arg3[%c0_1, %c0_2] : memref<2x1024xf32, #tpu.memory_space<vmem>>, vector<2x1024xf32>
    %2 = arith.subf %0, %1 : vector<2x1024xf32>
    %3 = arith.mulf %2, %2 : vector<2x1024xf32>
    %cst = arith.constant dense<0.000000e+00> : vector<2xf32>
    %4 = vector.multi_reduction <add>, %3, %cst [1] : vector<2x1024xf32> to vector<2xf32>
    %5 = vector.shape_cast %4 : vector<2xf32> to vector<1x1x2xf32>
    %c0_3 = arith.constant 0 : index
    %c0_4 = arith.constant 0 : index
    %c0_5 = arith.constant 0 : index
    %6 = vector.load %arg4[%c0_3, %c0_4, %c0_5] : memref<1x1x2xf32, #tpu.memory_space<vmem>>, vector<1x1x2xf32>
    tpu.vector_store %arg4[%c0_3, %c0_4, %c0_5], %5 {strides = array<i32>} : memref<1x1x2xf32, #tpu.memory_space<vmem>>, vector<1x1x2xf32>,
    return
  }
  func.func @transform_0(%arg0: i32, %arg1: i32) -> (i32, i32) {
    %c0_i32 = arith.constant 0 : i32
    return %arg0, %arg1 : i32, i32
  }
  func.func @transform_1(%arg0: i32, %arg1: i32) -> (i32, i32) {
    %c0_i32 = arith.constant 0 : i32
    return %arg0, %arg1 : i32, i32
  }
  func.func @transform_2(%arg0: i32, %arg1: i32) -> (i32, i32, i32) {
    %c0_i32 = arith.constant 0 : i32
    %c0_i32_0 = arith.constant 0 : i32
    return %arg0, %arg1, %c0_i32 : i32, i32, i32
  }
}

</mosaic_0001>

<bundles_post_ra>
// kernel: tpu_custom_call.1
= control target key start
LH: loop header
LB: loop body
LE: loop exit
PB: predicated region body
PF: predicated region fallthrough
CT: control target
= control target key end

     0   :  { %7 = vsyncpa [#allocation3], 0  ;;  %s228_s0 = inlined_call_operand.hbm [shape: f32[2,1024], index: 0, kind: input, shape index: {}]   ;;  %s229_s1 = inlined_call_operand.hbm [shape: f32[2,1024], index: 1, kind: input, shape index: {}]   ;;  %s230_s2 = inlined_call_operand.hbm [shape: f32[1,1,2], index: 2, kind: output, shape index: {}]  }
   0x1   :  { %8 = vsyncpa [#allocation6], 0 }
   0x2   :  { %9 = vsyncpa [#allocation4], 0  ;;  %s15_s11 = sshll.u32 %s228_s0, 4  ;;  %s193_s12 = smov [#allocation2]   ;;  %s16_s11 = int_to_ptr.hbm [resolvable:$true] %s15_s11 }
   0x3   :  { %s17_s13 = sshll.u32 %s193_s12, 4  ;;  %s26_s16 = sshll.u32 %s229_s1, 4  ;;  %s18_s13 = int_to_ptr.vmem [resolvable:$true] %s17_s13  ;;  %s27_s16 = int_to_ptr.hbm [resolvable:$true] %s26_s16 }
   0x4   :  { %20 = dma.hbm_to_vmem [thread:$0]  %s16_s11, 256, %s18_s13, [#allocation3]  }
   0x5   :  { %s194_s17 = smov [#allocation5]  }
   0x6   :  { %s28_s18 = sshll.u32 %s194_s17, 4  ;;  %s29_s18 = int_to_ptr.vmem [resolvable:$true] %s28_s18 }
   0x7   :  { %31 = dma.hbm_to_vmem [thread:$0]  %s27_s16, 256, %s29_s18, [#allocation6]  }
   0x8   :  { %187 = dma.done.wait [#allocation3], 256  }
   0x9   :  { %188 = vsyncadd [#allocation3], 4294967040 }
   0xa   :  { %189 = dma.done.wait [#allocation6], 256  }
   0xb   :  { %190 = vsyncadd [#allocation6], 4294967040  ;;  %v40_v0 = vld [vmem:[#allocation2] sm:$0xff]  ;;  %v41_v1 = vld [vmem:[#allocation2 + $0x8] sm:$0xff]  ;;  %vm69_vm0 = vcmask 1041408   ;;  %v88_v31 = vlaneseq  ;;  %s195_s0 = smov [#allocation7]  }
   0xc   :  { %v42_v2 = vld [vmem:[#allocation5] sm:$0xff]  ;;  %v43_v3 = vld [vmem:[#allocation5 + $0x8] sm:$0xff]  ;;  %s99_s1 = sshll.u32 %s195_s0, 4  ;;  %s101_s21 = sshll.u32 %s230_s2, 4  ;;  %vm92_vm1 = vcmask 8192   ;;  %s100_s1 = int_to_ptr.vmem [resolvable:$true] %s99_s1  ;;  %s102_s21 = int_to_ptr.hbm [resolvable:$true] %s101_s21 }
   0xd   :  { %v44_v4 = vsub.f32 %v40_v0, %v42_v2  ;;  %v45_v5 = vsub.f32 %v41_v1, %v43_v3  ;;  %v89_v32 = vand.u32 127, %v88_v31 }
   0xf   :  { %v46_v6 = vmul.f32 %v44_v4, %v44_v4  ;;  %v47_v7 = vmul.f32 %v45_v5, %v45_v5 }
  0x11   :  { %50 = vst [vmem:[#allocation1] ss:$4 sm:$0xff] %v46_v6 }
  0x12   :  { %52 = vst [vmem:[#allocation1 + $0x20] ss:$4 sm:$0xff] %v47_v7 }
  0x18   :  { %v53_v8 = vld.sshfl [vmem:[#allocation1] sm:$0xff pattern:$0x73625140]  ;;  %v54_v9 = vld.sshfl [vmem:[#allocation1 + $0x8] sm:$0xff pattern:$0x73625140] }
  0x19   :  { %v55_v10 = vld.sshfl [vmem:[#allocation1 + $0x10] sm:$0xff pattern:$0x73625140]  ;;  %v56_v11 = vld.sshfl [vmem:[#allocation1 + $0x18] sm:$0xff pattern:$0x73625140] }
  0x1a   :  { %v70_v12 = vsel %vm69_vm0, %v53_v8, 0.0  ;;  %v71_v13 = vsel %vm69_vm0, %v54_v9, 0.0  ;;  %v73_v14 = vsel %vm69_vm0, %v55_v10, 0.0  ;;  %v57_v15 = vld.sshfl [vmem:[#allocation1 + $0x20] sm:$0xff pattern:$0x73625140] }
  0x1b   :  { %v72_v16 = vadd.f32 %v71_v13, %v70_v12  ;;  %v75_v17 = vsel %vm69_vm0, %v56_v11, 0.0  ;;  %v58_v18 = vld.sshfl [vmem:[#allocation1 + $0x28] sm:$0xff pattern:$0x73625140]  ;;  %v77_v20 = vsel %vm69_vm0, %v57_v15, 0.0 }
  0x1c   :  { %v59_v21 = vld.sshfl [vmem:[#allocation1 + $0x30] sm:$0xff pattern:$0x73625140]  ;;  %v79_v23 = vsel %vm69_vm0, %v58_v18, 0.0 }
  0x1d   :  { %v74_v19 = vadd.f32 %v73_v14, %v72_v16  ;;  %v60_v24 = vld.sshfl [vmem:[#allocation1 + $0x38] sm:$0xff pattern:$0x73625140]  ;;  %v81_v26 = vsel %vm69_vm0, %v59_v21, 0.0 }
  0x1e   :  { %v83_v28 = vsel %vm69_vm0, %v60_v24, 0.0 }
  0x1f   :  { %v76_v22 = vadd.f32 %v75_v17, %v74_v19 }
  0x21   :  { %v78_v25 = vadd.f32 %v77_v20, %v76_v22 }
  0x23   :  { %v80_v27 = vadd.f32 %v79_v23, %v78_v25 }
  0x25   :  { %v82_v29 = vadd.f32 %v81_v26, %v80_v27 }
  0x27   :  { %v84_v30 = vadd.f32 %v83_v28, %v82_v29 }
  0x29   :  { %85 = vadd.xlane.f32.xlu0 %v84_v30 }
  0x9c   :  { %v86_v33 = vpop.xlane.xlu0 %85 }
  0x9d   :  { %v90_v34 = vperm.slane %v86_v33, %v89_v32 }
  0x9f   :  { %93 = vst.msk [vmem:[#allocation7] sm:$0x1] %vm92_vm1, %v90_v34 }
  0xa0   :  { %104 = dma.vmem_to_hbm [thread:$0]  %s100_s1, 16, %s102_s21, [#allocation4]  }
  0xa1   :  { %191 = dma.done.wait [#allocation4], 16  }
  0xa2   :  { %192 = vsyncadd [#allocation4], 4294967280 }
  0xa3   :  { %109 = vsyncpa [#allocation3], 1 }
  0xa4   :  { %110 = vsyncpa [#allocation6], 1 }
  0xa5   :  { %111 = vsyncpa [#allocation4], 1 }

</bundles_post_ra>
